<compile_context>
chip_gen: v7x
topology: tpu7x:2x2x1
jax: 0.10.0
libtpu: 0.0.40
codegen_flags: <defaults>
</compile_context>

<pallas_src>
import functools

import jax
import jax.numpy as jnp
from jax.experimental import pallas as pl
from jax.experimental.pallas import tpu as pltpu

EPS = 1e-5  # PyTorch InstanceNorm2d default eps


def _cond_in_kernel(ct, hw, needs_mask,
                    style_id_ref, x_ref, gamma_t_ref, beta_t_ref, o_ref):
    # x_ref:       (1, Ct, HWp)    current channel tile of the current sample
    # gamma_t_ref: (C, style_num)  resident per-style scales (transposed table)
    # beta_t_ref:  (C, style_num)  resident per-style shifts (transposed table)
    i = pl.program_id(0)            # batch index
    c = pl.program_id(1)            # channel-tile index
    style = style_id_ref[i]         # scalar style id from SMEM

    x = x_ref[...].astype(jnp.float32)                    # (1, Ct, HWp)
    inv_n = jnp.float32(1.0 / hw)

    # Per-channel mean over the true spatial extent (padding is zero-filled,
    # so the plain sum is already correct; divide by the true HW).
    mean = jnp.sum(x, axis=-1, keepdims=True) * inv_n     # (1, Ct, 1)

    # Cancellation-safe biased variance; exclude padded lanes when present.
    sq = jnp.square(x - mean)
    if needs_mask:
        pos = jax.lax.broadcasted_iota(jnp.int32, x.shape, 2)
        sq = jnp.where(pos < hw, sq, 0.0)
    var = jnp.sum(sq, axis=-1, keepdims=True) * inv_n     # (1, Ct, 1)
    inv_std = jax.lax.rsqrt(var + EPS)

    # Select this sample's style column from the resident tables without a
    # dynamic lane slice: one-hot lane mask + tiny cross-lane (XLU) reduce.
    if ct == gamma_t_ref.shape[0]:
        g_rows = gamma_t_ref[...].astype(jnp.float32)     # (Ct, style_num)
        b_rows = beta_t_ref[...].astype(jnp.float32)
    else:
        c0 = pl.multiple_of(c * ct, ct)
        g_rows = gamma_t_ref[pl.ds(c0, ct), :].astype(jnp.float32)
        b_rows = beta_t_ref[pl.ds(c0, ct), :].astype(jnp.float32)
    lane = jax.lax.broadcasted_iota(jnp.int32, g_rows.shape, 1)
    sel = lane == style
    gamma = jnp.sum(jnp.where(sel, g_rows, 0.0), axis=-1, keepdims=True)[None]  # (1, Ct, 1)
    beta = jnp.sum(jnp.where(sel, b_rows, 0.0), axis=-1, keepdims=True)[None]   # (1, Ct, 1)

    # Fused affine output pass: o = x * scale + shift.
    scale = gamma * inv_std
    shift = beta - mean * scale
    o_ref[...] = (x * scale + shift).astype(o_ref.dtype)


def _choose_channel_tile(C, hwp, itemsize, target_bytes=4 << 20):
    """Largest channel tile Ct (multiple of 8 dividing C, or C itself) with
    Ct * HWp * itemsize <= target_bytes."""
    per_ch = hwp * itemsize
    if C * per_ch <= target_bytes:
        return C
    best = None
    for ct in range(8, C + 1, 8):
        if C % ct == 0 and ct * per_ch <= target_bytes:
            best = ct
    if best is not None:
        return best
    for ct in range(8, C + 1, 8):
        if C % ct == 0:
            return ct  # smallest usable tile; VMEM limit is raised accordingly
    # TODO(synk): tile the HW axis (with a pl.when-finalized accumulator) for
    # inputs whose single-channel spatial slab alone exceeds VMEM.
    return C


@jax.jit
def cond_instance_norm2d(x, style_id, gamma_tab, beta_tab):
    """Conditional InstanceNorm2d.

    Args:
      x:         (N, C, H, W) input, NCHW (any float dtype; stats in f32).
      style_id:  (N,) int, style index per batch element.
      gamma_tab: (style_num, C) affine scale per style.
      beta_tab:  (style_num, C) affine shift per style.
    Returns:
      (N, C, H, W) output, same dtype as x.
    """
    N, C, H, W = x.shape
    style_num = gamma_tab.shape[0]
    HW = H * W
    HWp = ((HW + 127) // 128) * 128
    needs_mask = HWp != HW

    x_flat = x.reshape(N, C, HW)
    if needs_mask:
        x_flat = jnp.pad(x_flat, ((0, 0), (0, 0), (0, HWp - HW)))

    # Transposed (C, style_num) tables: channel on sublanes matches the x block
    # layout, and the constant index_map keeps them resident in VMEM.
    gamma_t = jnp.transpose(gamma_tab)
    beta_t = jnp.transpose(beta_tab)
    style_id = style_id.astype(jnp.int32)

    itemsize = x.dtype.itemsize
    ct = _choose_channel_tile(C, HWp, itemsize)
    block_bytes = ct * HWp * itemsize

    # VMEM budget: double-buffered input + output blocks, resident tables, headroom.
    tbl_bytes = 2 * (-(-C // 8) * 8) * (-(-style_num // 128) * 128) * 4
    needed = 4 * block_bytes + tbl_bytes + (2 << 20)
    vmem_limit = int(min(max(needed, 16 << 20), 64 << 20))

    cost = pl.CostEstimate(
        flops=6 * N * C * HW,
        transcendentals=N * C,
        bytes_accessed=2 * N * C * HW * itemsize + 2 * style_num * C * 4,
    )

    kernel = functools.partial(_cond_in_kernel, ct, HW, needs_mask)

    out_flat = pl.pallas_call(
        kernel,
        out_shape=jax.ShapeDtypeStruct((N, C, HWp), x.dtype),
        grid_spec=pltpu.PrefetchScalarGridSpec(
            num_scalar_prefetch=1,          # style_id lives in SMEM
            grid=(N, C // ct),
            in_specs=[
                pl.BlockSpec((1, ct, HWp), lambda i, c, sid: (i, c, 0)),
                pl.BlockSpec((C, style_num), lambda i, c, sid: (0, 0)),
                pl.BlockSpec((C, style_num), lambda i, c, sid: (0, 0)),
            ],
            out_specs=pl.BlockSpec((1, ct, HWp), lambda i, c, sid: (i, c, 0)),
        ),
        compiler_params=pltpu.CompilerParams(
            dimension_semantics=("parallel", "parallel"),
            vmem_limit_bytes=vmem_limit,
        ),
        cost_estimate=cost,
    )(style_id, x_flat, gamma_t, beta_t)

    if needs_mask:
        out_flat = out_flat[:, :, :HW]
    return out_flat.reshape(N, C, H, W)


def _reference(x, style_id, gamma_tab, beta_tab):
    xf = x.astype(jnp.float32)
    mean = jnp.mean(xf, axis=(2, 3), keepdims=True)
    var = jnp.mean((xf - mean) ** 2, axis=(2, 3), keepdims=True)
    g = gamma_tab[style_id][:, :, None, None].astype(jnp.float32)
    b = beta_tab[style_id][:, :, None, None].astype(jnp.float32)
    return ((xf - mean) / jnp.sqrt(var + EPS) * g + b).astype(x.dtype)


if __name__ == "__main__":
    key = jax.random.PRNGKey(0)
    k_x, k_g, k_b, k_x2 = jax.random.split(key, 4)

    # Case 1: lane-aligned spatial extent (HW % 128 == 0).
    N, C, H, W = 2, 4, 16, 16
    style_num = 3

    x = jax.random.normal(k_x, (N, C, H, W), dtype=jnp.float32)
    # PyTorch default init is weight=1, bias=0; perturb deterministically so
    # that style selection actually matters.
    gamma_tab = 1.0 + 0.1 * jax.random.normal(k_g, (style_num, C), dtype=jnp.float32)
    beta_tab = 0.1 * jax.random.normal(k_b, (style_num, C), dtype=jnp.float32)
    style_id = jnp.array([2, 0], dtype=jnp.int32)

    out = cond_instance_norm2d(x, style_id, gamma_tab, beta_tab)
    out = jax.block_until_ready(out)

    ref = _reference(x, style_id, gamma_tab, beta_tab)
    assert out.shape == (N, C, H, W)
    assert jnp.allclose(out, ref, atol=1e-4, rtol=1e-4), "mismatch vs reference"

    # Case 2: exercises the masked (padded) spatial path (HW % 128 != 0).
    H2, W2 = 9, 9
    x2 = jax.random.normal(k_x2, (N, C, H2, W2), dtype=jnp.float32)
    out2 = cond_instance_norm2d(x2, style_id, gamma_tab, beta_tab)
    out2 = jax.block_until_ready(out2)
    ref2 = _reference(x2, style_id, gamma_tab, beta_tab)
    assert out2.shape == (N, C, H2, W2)
    assert jnp.allclose(out2, ref2, atol=1e-4, rtol=1e-4), "mismatch vs reference (padded)"

    print("KERNEL_OK")
</pallas_src>

<mosaic_0001>
module attributes {stable_mosaic.version = 11 : i64} {
  func.func @_cond_in_kernel(%arg0: i32, %arg1: i32, %arg2: memref<2xi32, #tpu.memory_space<smem>>, %arg3: memref<1x4x256xf32, #tpu.memory_space<vmem>>, %arg4: memref<4x3xf32, #tpu.memory_space<vmem>>, %arg5: memref<4x3xf32, #tpu.memory_space<vmem>>, %arg6: memref<1x4x256xf32, #tpu.memory_space<vmem>>) attributes {dimension_semantics = [#tpu.dimension_semantics<parallel>, #tpu.dimension_semantics<parallel>], iteration_bounds = array<i64: 2, 1>, scalar_prefetch = 1 : i64, scratch_operands = 0 : i64, tpu.core_type = #tpu.core_type<tc>, window_params = [{transform_indices = @transform_0, window_bounds = array<i64: 1, 4, 256>}, {pipeline_mode = #tpu.pipeline_mode<synchronous>, transform_indices = @transform_1, window_bounds = array<i64: 4, 3>}, {pipeline_mode = #tpu.pipeline_mode<synchronous>, transform_indices = @transform_2, window_bounds = array<i64: 4, 3>}, {transform_indices = @transform_3, window_bounds = array<i64: 1, 4, 256>}]} {
    %0 = arith.index_cast %arg0 : i32 to index
    %1 = memref.load %arg2[%0] : memref<2xi32, #tpu.memory_space<smem>>
    %c0 = arith.constant 0 : index
    %c0_0 = arith.constant 0 : index
    %c0_1 = arith.constant 0 : index
    %2 = vector.load %arg3[%c0, %c0_0, %c0_1] : memref<1x4x256xf32, #tpu.memory_space<vmem>>, vector<1x4x256xf32>
    %cst = arith.constant dense<0.000000e+00> : vector<1x4xf32>
    %3 = vector.multi_reduction <add>, %2, %cst [2] : vector<1x4x256xf32> to vector<1x4xf32>
    %4 = vector.shape_cast %3 : vector<1x4xf32> to vector<1x4x1xf32>
    %cst_2 = arith.constant 3.906250e-03 : f32
    %5 = vector.broadcast %cst_2 : f32 to vector<1x4x1xf32>
    %6 = arith.mulf %4, %5 : vector<1x4x1xf32>
    %7 = vector.broadcast %6 : vector<1x4x1xf32> to vector<1x4x256xf32>
    %8 = arith.subf %2, %7 : vector<1x4x256xf32>
    %9 = arith.mulf %8, %8 : vector<1x4x256xf32>
    %cst_3 = arith.constant dense<0.000000e+00> : vector<1x4xf32>
    %10 = vector.multi_reduction <add>, %9, %cst_3 [2] : vector<1x4x256xf32> to vector<1x4xf32>
    %11 = vector.shape_cast %10 : vector<1x4xf32> to vector<1x4x1xf32>
    %cst_4 = arith.constant 3.906250e-03 : f32
    %12 = vector.broadcast %cst_4 : f32 to vector<1x4x1xf32>
    %13 = arith.mulf %11, %12 : vector<1x4x1xf32>
    %cst_5 = arith.constant 9.99999974E-6 : f32
    %14 = vector.broadcast %cst_5 : f32 to vector<1x4x1xf32>
    %15 = arith.addf %13, %14 : vector<1x4x1xf32>
    %16 = math.rsqrt %15 : vector<1x4x1xf32>
    %c0_6 = arith.constant 0 : index
    %c0_7 = arith.constant 0 : index
    %17 = vector.load %arg4[%c0_6, %c0_7] : memref<4x3xf32, #tpu.memory_space<vmem>>, vector<4x3xf32>
    %c0_8 = arith.constant 0 : index
    %c0_9 = arith.constant 0 : index
    %18 = vector.load %arg5[%c0_8, %c0_9] : memref<4x3xf32, #tpu.memory_space<vmem>>, vector<4x3xf32>
    %19 = tpu.iota {dimensions = array<i32: 1>} : vector<4x3xi32>
    %20 = vector.broadcast %1 : i32 to vector<4x3xi32>
    %21 = arith.cmpi eq, %19, %20 : vector<4x3xi32>
    %cst_10 = arith.constant 0.000000e+00 : f32
    %22 = vector.broadcast %cst_10 : f32 to vector<4x3xf32>
    %23 = arith.select %21, %17, %22 : vector<4x3xi1>, vector<4x3xf32>
    %cst_11 = arith.constant dense<0.000000e+00> : vector<4xf32>
    %24 = vector.multi_reduction <add>, %23, %cst_11 [1] : vector<4x3xf32> to vector<4xf32>
    %25 = vector.shape_cast %24 : vector<4xf32> to vector<4x1xf32>
    %26 = vector.shape_cast %25 : vector<4x1xf32> to vector<1x4x1xf32>
    %cst_12 = arith.constant 0.000000e+00 : f32
    %27 = vector.broadcast %cst_12 : f32 to vector<4x3xf32>
    %28 = arith.select %21, %18, %27 : vector<4x3xi1>, vector<4x3xf32>
    %cst_13 = arith.constant dense<0.000000e+00> : vector<4xf32>
    %29 = vector.multi_reduction <add>, %28, %cst_13 [1] : vector<4x3xf32> to vector<4xf32>
    %30 = vector.shape_cast %29 : vector<4xf32> to vector<4x1xf32>
    %31 = vector.shape_cast %30 : vector<4x1xf32> to vector<1x4x1xf32>
    %32 = arith.mulf %26, %16 : vector<1x4x1xf32>
    %33 = arith.mulf %6, %32 : vector<1x4x1xf32>
    %34 = arith.subf %31, %33 : vector<1x4x1xf32>
    %35 = vector.broadcast %32 : vector<1x4x1xf32> to vector<1x4x256xf32>
    %36 = arith.mulf %2, %35 : vector<1x4x256xf32>
    %37 = vector.broadcast %34 : vector<1x4x1xf32> to vector<1x4x256xf32>
    %38 = arith.addf %36, %37 : vector<1x4x256xf32>
    %c0_14 = arith.constant 0 : index
    %c0_15 = arith.constant 0 : index
    %c0_16 = arith.constant 0 : index
    %39 = vector.load %arg6[%c0_14, %c0_15, %c0_16] : memref<1x4x256xf32, #tpu.memory_space<vmem>>, vector<1x4x256xf32>
    tpu.vector_store %arg6[%c0_14, %c0_15, %c0_16], %38 {strides = array<i32>} : memref<1x4x256xf32, #tpu.memory_space<vmem>>, vector<1x4x256xf32>,
    return
  }
  func.func @transform_0(%arg0: i32, %arg1: i32, %arg2: memref<2xi32, #tpu.memory_space<smem>>) -> (i32, i32, i32) {
    %c0_i32 = arith.constant 0 : i32
    %c0_i32_0 = arith.constant 0 : i32
    return %arg0, %arg1, %c0_i32 : i32, i32, i32
  }
  func.func @transform_1(%arg0: i32, %arg1: i32, %arg2: memref<2xi32, #tpu.memory_space<smem>>) -> (i32, i32) {
    %c0_i32 = arith.constant 0 : i32
    %c0_i32_0 = arith.constant 0 : i32
    %c0_i32_1 = arith.constant 0 : i32
    return %c0_i32, %c0_i32_0 : i32, i32
  }
  func.func @transform_2(%arg0: i32, %arg1: i32, %arg2: memref<2xi32, #tpu.memory_space<smem>>) -> (i32, i32) {
    %c0_i32 = arith.constant 0 : i32
    %c0_i32_0 = arith.constant 0 : i32
    %c0_i32_1 = arith.constant 0 : i32
    return %c0_i32, %c0_i32_0 : i32, i32
  }
  func.func @transform_3(%arg0: i32, %arg1: i32, %arg2: memref<2xi32, #tpu.memory_space<smem>>) -> (i32, i32, i32) {
    %c0_i32 = arith.constant 0 : i32
    %c0_i32_0 = arith.constant 0 : i32
    return %arg0, %arg1, %c0_i32 : i32, i32, i32
  }
}

</mosaic_0001>

<bundles_post_ra>
// kernel: cond_instance_norm2d.1
= control target key start
LH: loop header
LB: loop body
LE: loop exit
PB: predicated region body
PF: predicated region fallthrough
CT: control target
= control target key end

     0   :  { %s539_s0 = inlined_call_operand.vmem [shape: s32[2], index: 0, kind: input, shape index: {}]   ;;  %s540_s1 = inlined_call_operand.vmem [shape: f32[2,4,256], index: 1, kind: input, shape index: {}]   ;;  %s541_s2 = inlined_call_operand.vmem [shape: f32[4,3], index: 2, kind: input, shape index: {}]   ;;  %s542_s3 = inlined_call_operand.vmem [shape: f32[4,3], index: 3, kind: input, shape index: {}]   ;;  %s543_s4 = inlined_call_operand.vmem [shape: f32[2,4,256], index: 4, kind: output, shape index: {}]  }
   0x1   :  { %s9_s17 = sshll.u32 %s539_s0, 4  ;;  %s10_s17 = int_to_ptr.vmem [resolvable:$true] %s9_s17 }
   0x2   :  { %s421_s18 = scalar_lea.vmem %s10_s17, 16  ;;  %p426_p1 = scmp.lt.s32.totalorder %s10_s17, %s10_s17 }
   0x3   :  { %p422_p0 = scmp.ne.s32.totalorder %s10_s17, %s421_s18  ;;  %p427_p2 = scmp.lt.s32.totalorder %s421_s18, %s421_s18 }
   0x5   :  { %p428_p3 = por %p427_p2, %p426_p1 }
   0x7   :  { %p429_p4 = pnand %p428_p3, %p422_p0 }
   0x9   :  { %432 = shalt.err (!%p429_p4)  }
   0xa   :  { %s459_s19 = smov [#allocation3]  }
   0xb   :  { %12 = dma.vmem_to_smem %s10_s17, 16, %s459_s19, [#allocation2] }
   0xc   :  { %445 = dma.done.wait [#allocation2], 16 }
   0xd   :  { %446 = vsyncadd [#allocation2], 4294967280 }
   0xe   :  { %14 = sfence }
   0xf   :  { %s489_s20 = smov 0   ;;  %s491_s21 = smov 0  }
  0x10   :  { %s493_s22 = smov 0  }
  0x11 LB: > { %s32_s0 = sadd.s32 1, %s453_s21  ;;  %p383_p5 = scmp.ge.s32.totalorder %s457_s22, 1  ;;  %s457_s22 = sphi %s493_s22, %s20_s22   ;;  %s453_s21 = sphi %s491_s21, %s545_s21   ;;  %s449_s20 = sphi %s489_s20, %s544_s20  }
  0x12   : > { %p34_p6 = scmp.ge.s32.totalorder %s32_s0, 2  ;;  %p164_p7 = scmp.lt.s32.totalorder %s457_s22, 3 }
  0x14   : > { %s547_s0 = smov (%p34_p6, %s32_s0), 0  ;;  %p165_p8 = pnand %p383_p5, %p164_p7 }
  0x15   : > { %p196_p9 = scmp.lt.s32.totalorder (!%p165_p8), %s449_s20, 1  ;;  %vm219_vm0 = vcmask (!%p165_p8), 1043456   ;;  %s214_s28 = sld [smem:[#allocation3 + %s449_s20]] (!%p165_p8)  ;;  %v230_v5 = vlaneseq (!%p165_p8)  ;;  %v248_v7 = vld [vmem:[%s541_s2] sm:$0xf] (!%p165_p8)  ;;  %vm255_vm1 = vcmask (!%p165_p8), 19456  }
  0x16   : > { %168 = sbr.rel (%p165_p8) target bundleno = 362 (0x16a), region = 32  ;;  %v249_v8 = vld [vmem:[%s542_s3] sm:$0xf] (!%p165_p8)  ;;  %v460_v14 = vmov (!%p165_p8), 839922192  }
  0x17   : > { %v251_v6 = vand.u32 (!%p165_p8), 127, %v230_v5  ;;  %v228_v15 = vunpack.c.l.s4 (!%p165_p8), %v460_v14  ;;  %v231_v17 = vshrl.u32 (!%p165_p8), %v230_v5, 7 }
  0x19   : > { %v229_v16 = vunpack.c.0.s8 (!%p165_p8), %v228_v15 }
  0x1b   : > { %v252_v9 = vstv (!%p165_p8), %s214_s28  ;;  %v232_v18 = vsub.s32 (!%p165_p8), %v229_v16, %v231_v17 }
  0x1c   : > { %vm253_vm2 = vcmp.eq.s32.totalorder (!%p165_p8), %v251_v6, %v252_v9 }
  0x1d   : > { %s507_s23 = scalar_select %p196_p9, %s449_s20, 1  ;;  %v254_v10 = vsel %vm253_vm2, %v248_v7, 0.0  ;;  %v259_v11 = vsel %vm253_vm2, %v249_v8, 0.0 }
  0x1e   : > { %v256_v12 = vsel %vm255_vm1, %v254_v10, 0.0  ;;  %v260_v13 = vsel %vm255_vm1, %v259_v11, 0.0 }
  0x1f   : > { %s390_s24 = sshll.u32 %s507_s23, 3  ;;  %257 = vadd.xlane.f32.xlu1 %v256_v12 }
  0x20   : > { %s204_s27 = scalar_lea.vmem %s540_s1, %s390_s24  ;;  %s213_s9 = scalar_lea.vmem %s543_s4, %s390_s24 }
  0x21   : > { %v215_v0 = vld [vmem:[%s204_s27] sm:$0xff] }
  0x22   : > { %v217_v1 = vcombine.high %v215_v0, %v215_v0  ;;  %v220_v2 = vsel %vm219_vm0, %v215_v0, 0.0 }
  0x23   : > { %261 = vadd.xlane.f32.xlu1 %v260_v13 }
  0x24   : > { %v221_v3 = vsel %vm219_vm0, %v217_v1, 0.0 }
  0x25   : > { %v222_v4 = vadd.f32 %v221_v3, %v220_v2 }
  0x27   : > { %223 = vadd.xlane.f32.xlu0 %v222_v4 }
  0xac   : > { %v258_v31 = vpop.xlane.xlu1 %257 }
  0xb0   : > { %v262_v34 = vpop.xlane.xlu1 %261 }
  0xb4   : > { %v224_v19 = vpop.xlane.xlu0 %223 }
  0xb5   : > { %v225_v20 = vmul.f32 0.00390625, %v224_v19 }
  0xb7   : > { %v233_v21 = vrot.slane %v225_v20, %v232_v18 }
  0xb9   : > { %v235_v22 = vsub.f32 %v215_v0, %v233_v21 }
  0xbb   : > { %v236_v23 = vmul.f32 %v235_v22, %v235_v22 }
  0xbd   : > { %v238_v24 = vcombine.high %v236_v23, %v236_v23  ;;  %v240_v25 = vsel %vm219_vm0, %v236_v23, 0.0 }
  0xbf   : > { %v241_v26 = vsel %vm219_vm0, %v238_v24, 0.0 }
  0xc0   : > { %v242_v27 = vadd.f32 %v241_v26, %v240_v25 }
  0xc2   : > { %243 = vadd.xlane.f32.xlu0 %v242_v27 }
 0x14f   : > { %v244_v28 = vpop.xlane.xlu0 %243 }
 0x150   : > { %v245_v29 = vmul.f32 0.00390625, %v244_v28 }
 0x152   : > { %v246_v30 = vadd.f32 1e-05, %v245_v29 }
 0x154   : > { %419 = vrsqrt.f32 %v246_v30 }
 0x15e   : > { %v420_v32 = vpop.eup %419 }
 0x15f   : > { %v263_v33 = vmul.f32 %v420_v32, %v258_v31 }
 0x161   : > { %v273_v35 = vrot.slane %v263_v33, %v232_v18  ;;  %v264_v36 = vmul.f32 %v263_v33, %v225_v20 }
 0x163   : > { %v265_v37 = vsub.f32 %v262_v34, %v264_v36  ;;  %v275_v38 = vmul.f32 %v273_v35, %v215_v0 }
 0x165   : > { %v283_v39 = vrot.slane %v265_v37, %v232_v18 }
 0x167   : > { %v285_v40 = vadd.f32 %v283_v39, %v275_v38 }
 0x169   : > { %286 = vst [vmem:[%s213_s9] sm:$0xff] %v285_v40 }
 0x16a PF: > { %s20_s22 = sadd.s32 1, %s457_s22   ;;  %s544_s20 = smov %s453_s21 }
 0x16b   : > { %p17_p10 = scmp.ge.s32.totalorder %s20_s22, 4   ;;  %s545_s21 = smov %s547_s0 }
 0x16d   :  { %19 = sbr.rel (!%p17_p10) target bundleno = 17 (0x11), region = 62 }

</bundles_post_ra>
